<compile_context>
chip_gen: v7x
topology: tpu7x:2x2x1
jax: 0.10.0
libtpu: 0.0.40
codegen_flags: <defaults>
</compile_context>

<pallas_src>
import functools

import jax
import jax.numpy as jnp
from jax.experimental import pallas as pl
from jax.experimental.pallas import tpu as pltpu


def _round_up(x, m):
    return ((x + m - 1) // m) * m


def _pad2d(a, rows, cols):
    return jnp.pad(a, ((0, rows - a.shape[0]), (0, cols - a.shape[1])))


def _tpu_vmem_bytes():
    try:
        return int(pltpu.get_tpu_info().vmem_capacity_bytes)
    except Exception:
        return 64 * 1024 * 1024  # conservative (v7x per-TensorCore)


def _default_fuse_threshold():
    # 128 MiB VMEM (v5e/v6e): whole-graph-resident fused kernel up to ~4096 nodes.
    # 64 MiB (v7x) or unknown: stay at 2048 so bf16 A + f32 intermediates fit.
    return 4096 if _tpu_vmem_bytes() >= 100 * 1024 * 1024 else 2048


# ---------------------------------------------------------------------------
# Graph preprocessing: padded bf16 adjacency counts + D^{-1/2} vector.
# Matches torch_geometric gcn_norm with add_self_loops=True
# (add_remaining_self_loops: existing self-loop edges are replaced by exactly one
# unit self-loop per node).  A_hat = dinv[:,None] * A * dinv[None,:] is never built;
# dinv is applied to Z rows / output rows instead.
# ---------------------------------------------------------------------------
def build_graph(edge_index, num_nodes, n_rows, n_cols):
    src, dst = edge_index[0], edge_index[1]
    w = jnp.where(src != dst, 1.0, 0.0).astype(jnp.float32)          # drop existing self loops
    deg = jnp.zeros((num_nodes,), jnp.float32).at[dst].add(w) + 1.0  # +1 for the self loop
    diag = jnp.arange(num_nodes, dtype=edge_index.dtype)
    adj = (jnp.zeros((n_rows, n_cols), jnp.bfloat16)                 # A[i, j] = #edges j -> i
           .at[dst, src].add(w.astype(jnp.bfloat16))
           .at[diag, diag].set(1.0))
    dinv = jnp.zeros((n_rows, 1), jnp.float32).at[:num_nodes, 0].set(jax.lax.rsqrt(deg))
    return adj, dinv


# ---------------------------------------------------------------------------
# Fused kernel: conv1 + ReLU + conv2 in one VMEM-resident pass (small/medium N).
# Adjacency is loaded into VMEM once (bf16 counts) and reused by both layers; the
# hidden activation never touches HBM.
# ---------------------------------------------------------------------------
def fused_gcn_kernel(adj_ref, dinv_ref, x_ref, w1_ref, b1_ref, w2_ref, b2_ref, o_ref):
    adj = adj_ref[...]                                               # (Np, Np) bf16 counts
    dinv = dinv_ref[...]                                             # (Np, 1)  f32
    # Layer 1: relu( dinv * (A @ (dinv * (X @ W1))) + b1 )
    z1 = jnp.dot(x_ref[...], w1_ref[...], preferred_element_type=jnp.float32)
    z1 = (dinv * z1).astype(jnp.bfloat16)
    h = dinv * jnp.dot(adj, z1, preferred_element_type=jnp.float32) + b1_ref[...]
    h = jnp.maximum(h, 0.0)                                          # f32 epilogue (VPU)
    # Layer 2: dinv * (A @ (dinv * (h @ W2))) + b2
    z2 = jnp.dot(h.astype(jnp.bfloat16), w2_ref[...], preferred_element_type=jnp.float32)
    z2 = (dinv * z2).astype(jnp.bfloat16)
    out = dinv * jnp.dot(adj, z2, preferred_element_type=jnp.float32) + b2_ref[...]
    o_ref[...] = out.astype(o_ref.dtype)


def gnn_fused_forward(adj_p, dinv_p, x, params):
    n, f_in = x.shape
    n_p = adj_p.shape[0]
    hid = params["w1"].shape[1]
    out_dim = params["w2"].shape[1]
    hid_p = _round_up(hid, 128)
    out_p = _round_up(out_dim, 128)

    x_p = _pad2d(x, n_p, f_in).astype(jnp.bfloat16)
    w1_p = _pad2d(params["w1"], f_in, hid_p).astype(jnp.bfloat16)
    b1_p = _pad2d(params["b1"].reshape(1, hid).astype(jnp.float32), 1, hid_p)
    w2_p = _pad2d(params["w2"], hid_p, out_p).astype(jnp.bfloat16)
    b2_p = _pad2d(params["b2"].reshape(1, out_dim).astype(jnp.float32), 1, out_p)

    # Explicit VMEM budget so the single-launch kernel compiles on v5e (16 MiB default
    # scoped limit) while staying inside the physical capacity of the current chip.
    need = (adj_p.size * 2 + x_p.size * 2 + w1_p.size * 2 + w2_p.size * 2
            + (b1_p.size + b2_p.size + n_p) * 4
            + n_p * out_p * 4                        # f32 output
            + 4 * n_p * max(hid_p, out_p) * 4)       # f32/bf16 intermediates
    vmem_limit = int(min(_tpu_vmem_bytes(), max(32 * 1024 * 1024, 2 * need)))

    y = pl.pallas_call(
        fused_gcn_kernel,
        out_shape=jax.ShapeDtypeStruct((n_p, out_p), jnp.float32),
        in_specs=[
            pl.BlockSpec((n_p, n_p), lambda: (0, 0)),
            pl.BlockSpec((n_p, 1), lambda: (0, 0)),
            pl.BlockSpec((n_p, f_in), lambda: (0, 0)),
            pl.BlockSpec((f_in, hid_p), lambda: (0, 0)),
            pl.BlockSpec((1, hid_p), lambda: (0, 0)),
            pl.BlockSpec((hid_p, out_p), lambda: (0, 0)),
            pl.BlockSpec((1, out_p), lambda: (0, 0)),
        ],
        out_specs=pl.BlockSpec((n_p, out_p), lambda: (0, 0)),
        compiler_params=pltpu.CompilerParams(vmem_limit_bytes=vmem_limit),
    )(adj_p, dinv_p, x_p, w1_p, b1_p, w2_p, b2_p)
    return y[:n, :out_dim]


# ---------------------------------------------------------------------------
# Row/K-tiled aggregation kernel (larger N): out = epilogue(dinv_row * (A @ Z) + b).
# Z = dinv * (X @ W) is hoisted to the wrapper, so each grid step is one lane-dense
# MXU matmul on a (tm, tk) bf16 adjacency tile; per-step VMEM is independent of N.
# ---------------------------------------------------------------------------
def gcn_agg_kernel(adj_ref, dinv_ref, z_ref, b_ref, o_ref, acc_ref, *, apply_relu):
    k = pl.program_id(1)

    @pl.when(k == 0)
    def _():
        acc_ref[...] = jnp.zeros_like(acc_ref)

    acc_ref[...] += jnp.dot(adj_ref[...], z_ref[...],
                            preferred_element_type=jnp.float32)

    @pl.when(k == pl.num_programs(1) - 1)
    def _():
        out = dinv_ref[...] * acc_ref[...] + b_ref[...]
        if apply_relu:
            out = jnp.maximum(out, 0.0)
        o_ref[...] = out.astype(o_ref.dtype)


def gcn_agg_tiled(adj_p, dinv_r, z_scaled, b_p, *, apply_relu, out_dtype, tm, tk):
    n_pr, n_pc = adj_p.shape
    f_out_p = z_scaled.shape[1]
    kernel = functools.partial(gcn_agg_kernel, apply_relu=apply_relu)
    return pl.pallas_call(
        kernel,
        out_shape=jax.ShapeDtypeStruct((n_pr, f_out_p), out_dtype),
        grid=(n_pr // tm, n_pc // tk),
        in_specs=[
            pl.BlockSpec((tm, tk), lambda i, k: (i, k)),        # adjacency tile (bf16 counts)
            pl.BlockSpec((tm, 1), lambda i, k: (i, 0)),         # dinv for the output rows
            pl.BlockSpec((tk, f_out_p), lambda i, k: (k, 0)),   # dinv-scaled X@W slab
            pl.BlockSpec((1, f_out_p), lambda i, k: (0, 0)),    # bias
        ],
        out_specs=pl.BlockSpec((tm, f_out_p), lambda i, k: (i, 0)),
        scratch_shapes=[pltpu.VMEM((tm, f_out_p), jnp.float32)],
        compiler_params=pltpu.CompilerParams(
            dimension_semantics=("parallel", "arbitrary")),
    )(adj_p, dinv_r, z_scaled, b_p)


def gnn_tiled_forward(adj_p, dinv_r, dinv_c, x, params, *, tm, tk):
    n, f_in = x.shape
    n_pr, n_pc = adj_p.shape
    hid = params["w1"].shape[1]
    out_dim = params["w2"].shape[1]
    hid_p = _round_up(hid, 128)
    out_p = _round_up(out_dim, 128)

    w1_p = _pad2d(params["w1"], f_in, hid_p).astype(jnp.bfloat16)
    b1_p = _pad2d(params["b1"].reshape(1, hid).astype(jnp.float32), 1, hid_p)
    w2_p = _pad2d(params["w2"], hid_p, out_p).astype(jnp.bfloat16)
    b2_p = _pad2d(params["b2"].reshape(1, out_dim).astype(jnp.float32), 1, out_p)

    # Hoisted feature transforms (tiny, plain XLA): Z = dinv * (X @ W) in bf16.
    x_p = _pad2d(x, n_pc, f_in).astype(jnp.bfloat16)
    z1 = (dinv_c * jnp.dot(x_p, w1_p, preferred_element_type=jnp.float32)
          ).astype(jnp.bfloat16)
    h = gcn_agg_tiled(adj_p, dinv_r, z1, b1_p, apply_relu=True,
                      out_dtype=jnp.bfloat16, tm=tm, tk=tk)          # (n_pr, hid_p) bf16
    h_c = _pad2d(h[:n], n_pc, hid_p)                                 # re-pad rows for K dim
    z2 = (dinv_c * jnp.dot(h_c, w2_p, preferred_element_type=jnp.float32)
          ).astype(jnp.bfloat16)
    y = gcn_agg_tiled(adj_p, dinv_r, z2, b2_p, apply_relu=False,
                      out_dtype=jnp.float32, tm=tm, tk=tk)
    return y[:n, :out_dim]


# ---------------------------------------------------------------------------
# Top level: conv1 -> ReLU -> conv2, matching GNNModel.forward.
# ---------------------------------------------------------------------------
def gnn_model_forward(x, edge_index, params, *, fuse_threshold_nodes=None,
                      tm=256, tk=2048):
    n = x.shape[0]
    if fuse_threshold_nodes is None:
        fuse_threshold_nodes = _default_fuse_threshold()

    if n <= fuse_threshold_nodes:
        n_p = _round_up(max(n, 8), 128)          # lane/MXU-aligned node count
        adj_p, dinv_p = build_graph(edge_index, n, n_p, n_p)
        return gnn_fused_forward(adj_p, dinv_p, x, params)

    # Row/K-tiled two-pass path.  Rows padded to tm, contraction dim padded to tk
    # independently (asymmetric padding keeps the O(N^2) HBM stream tight).
    n_pr = _round_up(n, tm)
    tk = min(tk, _round_up(n, 128))
    n_pc = _round_up(n, tk)
    adj_p, dinv_r = build_graph(edge_index, n, n_pr, n_pc)
    dinv_c = _pad2d(dinv_r[:n], n_pc, 1)
    return gnn_tiled_forward(adj_p, dinv_r, dinv_c, x, params, tm=tm, tk=tk)


# ---------------------------------------------------------------------------
# Pure-JAX f32 reference (matches torch_geometric GCNConv semantics).
# ---------------------------------------------------------------------------
def gnn_reference(x, edge_index, params):
    n = x.shape[0]
    src, dst = edge_index[0], edge_index[1]
    w = jnp.where(src != dst, 1.0, 0.0).astype(jnp.float32)
    diag = jnp.arange(n)
    adj = (jnp.zeros((n, n), jnp.float32).at[dst, src].add(w).at[diag, diag].set(1.0))
    dinv = jax.lax.rsqrt(adj.sum(axis=1))
    a_hat = dinv[:, None] * adj * dinv[None, :]
    h = jnp.maximum(a_hat @ (x @ params["w1"]) + params["b1"], 0.0)
    return a_hat @ (h @ params["w2"]) + params["b2"]


def init_params(key, input_dim, hidden_dim, output_dim):
    k1, k2 = jax.random.split(key)

    def glorot(k, fan_in, fan_out):
        limit = (6.0 / (fan_in + fan_out)) ** 0.5
        return jax.random.uniform(k, (fan_in, fan_out), jnp.float32, -limit, limit)

    return {
        "w1": glorot(k1, input_dim, hidden_dim),
        "b1": jnp.zeros((hidden_dim,), jnp.float32),
        "w2": glorot(k2, hidden_dim, output_dim),
        "b2": jnp.zeros((output_dim,), jnp.float32),
    }


if __name__ == "__main__":
    key = jax.random.PRNGKey(0)
    kx, ke, kp, kx2, ke2 = jax.random.split(key, 5)

    num_nodes, input_dim, hidden_dim, output_dim, num_edges = 8, 16, 32, 8, 16

    x = jax.random.normal(kx, (num_nodes, input_dim), jnp.float32)
    edge_index = jax.random.randint(ke, (2, num_edges), 0, num_nodes, jnp.int32)
    params = init_params(kp, input_dim, hidden_dim, output_dim)

    # Small graph -> fused single-launch path.
    out = gnn_model_forward(x, edge_index, params)
    jax.block_until_ready(out)
    assert out.shape == (num_nodes, output_dim)
    ref = gnn_reference(x, edge_index, params)
    err = float(jnp.max(jnp.abs(out - ref)))
    assert jnp.allclose(out, ref, atol=5e-2, rtol=5e-2), err

    # Exercise the row/K-tiled grid path (multiple row tiles AND multiple K steps,
    # including asymmetric row/col padding), as used for larger graphs.
    n2, e2 = 384, 1024
    x2 = jax.random.normal(kx2, (n2, input_dim), jnp.float32)
    edge_index2 = jax.random.randint(ke2, (2, e2), 0, n2, jnp.int32)
    out2 = gnn_model_forward(x2, edge_index2, params,
                             fuse_threshold_nodes=0, tm=128, tk=256)
    jax.block_until_ready(out2)
    assert out2.shape == (n2, output_dim)
    ref2 = gnn_reference(x2, edge_index2, params)
    err2 = float(jnp.max(jnp.abs(out2 - ref2)))
    assert jnp.allclose(out2, ref2, atol=5e-2, rtol=5e-2), err2

    print("KERNEL_OK")
</pallas_src>

<mosaic_0001>
module attributes {stable_mosaic.version = 11 : i64} {
  func.func @fused_gcn_kernel(%arg0: memref<128x128xbf16, #tpu.memory_space<vmem>>, %arg1: memref<128x1xf32, #tpu.memory_space<vmem>>, %arg2: memref<128x16xbf16, #tpu.memory_space<vmem>>, %arg3: memref<16x128xbf16, #tpu.memory_space<vmem>>, %arg4: memref<1x128xf32, #tpu.memory_space<vmem>>, %arg5: memref<128x128xbf16, #tpu.memory_space<vmem>>, %arg6: memref<1x128xf32, #tpu.memory_space<vmem>>, %arg7: memref<128x128xf32, #tpu.memory_space<vmem>>) attributes {dimension_semantics = [], scalar_prefetch = 0 : i64, scratch_operands = 0 : i64, tpu.core_type = #tpu.core_type<tc>} {
    %c0 = arith.constant 0 : index
    %c0_0 = arith.constant 0 : index
    %0 = vector.load %arg0[%c0, %c0_0] : memref<128x128xbf16, #tpu.memory_space<vmem>>, vector<128x128xbf16>
    %c0_1 = arith.constant 0 : index
    %c0_2 = arith.constant 0 : index
    %1 = vector.load %arg1[%c0_1, %c0_2] : memref<128x1xf32, #tpu.memory_space<vmem>>, vector<128x1xf32>
    %c0_3 = arith.constant 0 : index
    %c0_4 = arith.constant 0 : index
    %2 = vector.load %arg2[%c0_3, %c0_4] : memref<128x16xbf16, #tpu.memory_space<vmem>>, vector<128x16xbf16>
    %c0_5 = arith.constant 0 : index
    %c0_6 = arith.constant 0 : index
    %3 = vector.load %arg3[%c0_5, %c0_6] : memref<16x128xbf16, #tpu.memory_space<vmem>>, vector<16x128xbf16>
    %cst = arith.constant dense<0.000000e+00> : vector<128x128xf32>
    %4 = tpu.matmul %2, %3, %cst {dimension_numbers = #tpu.dot_dimension_numbers<[1], [0], [0], [1], [0, 0, 1, 1], [], []>} : vector<128x16xbf16>, vector<16x128xbf16>, vector<128x128xf32> -> vector<128x128xf32>
    %5 = vector.broadcast %1 : vector<128x1xf32> to vector<128x128xf32>
    %6 = arith.mulf %5, %4 : vector<128x128xf32>
    %7 = arith.truncf %6 : vector<128x128xf32> to vector<128x128xbf16>
    %cst_7 = arith.constant dense<0.000000e+00> : vector<128x128xf32>
    %8 = tpu.matmul %0, %7, %cst_7 {dimension_numbers = #tpu.dot_dimension_numbers<[1], [0], [0], [1], [0, 0, 1, 1], [], []>} : vector<128x128xbf16>, vector<128x128xbf16>, vector<128x128xf32> -> vector<128x128xf32>
    %9 = vector.broadcast %1 : vector<128x1xf32> to vector<128x128xf32>
    %10 = arith.mulf %9, %8 : vector<128x128xf32>
    %c0_8 = arith.constant 0 : index
    %c0_9 = arith.constant 0 : index
    %11 = vector.load %arg4[%c0_8, %c0_9] : memref<1x128xf32, #tpu.memory_space<vmem>>, vector<1x128xf32>
    %12 = vector.broadcast %11 : vector<1x128xf32> to vector<128x128xf32>
    %13 = arith.addf %10, %12 : vector<128x128xf32>
    %cst_10 = arith.constant 0.000000e+00 : f32
    %14 = vector.broadcast %cst_10 : f32 to vector<128x128xf32>
    %15 = arith.maximumf %13, %14 : vector<128x128xf32>
    %16 = arith.truncf %15 : vector<128x128xf32> to vector<128x128xbf16>
    %c0_11 = arith.constant 0 : index
    %c0_12 = arith.constant 0 : index
    %17 = vector.load %arg5[%c0_11, %c0_12] : memref<128x128xbf16, #tpu.memory_space<vmem>>, vector<128x128xbf16>
    %cst_13 = arith.constant dense<0.000000e+00> : vector<128x128xf32>
    %18 = tpu.matmul %16, %17, %cst_13 {dimension_numbers = #tpu.dot_dimension_numbers<[1], [0], [0], [1], [0, 0, 1, 1], [], []>} : vector<128x128xbf16>, vector<128x128xbf16>, vector<128x128xf32> -> vector<128x128xf32>
    %19 = vector.broadcast %1 : vector<128x1xf32> to vector<128x128xf32>
    %20 = arith.mulf %19, %18 : vector<128x128xf32>
    %21 = arith.truncf %20 : vector<128x128xf32> to vector<128x128xbf16>
    %cst_14 = arith.constant dense<0.000000e+00> : vector<128x128xf32>
    %22 = tpu.matmul %0, %21, %cst_14 {dimension_numbers = #tpu.dot_dimension_numbers<[1], [0], [0], [1], [0, 0, 1, 1], [], []>} : vector<128x128xbf16>, vector<128x128xbf16>, vector<128x128xf32> -> vector<128x128xf32>
    %23 = vector.broadcast %1 : vector<128x1xf32> to vector<128x128xf32>
    %24 = arith.mulf %23, %22 : vector<128x128xf32>
    %c0_15 = arith.constant 0 : index
    %c0_16 = arith.constant 0 : index
    %25 = vector.load %arg6[%c0_15, %c0_16] : memref<1x128xf32, #tpu.memory_space<vmem>>, vector<1x128xf32>
    %26 = vector.broadcast %25 : vector<1x128xf32> to vector<128x128xf32>
    %27 = arith.addf %24, %26 : vector<128x128xf32>
    %c0_17 = arith.constant 0 : index
    %c0_18 = arith.constant 0 : index
    %28 = vector.load %arg7[%c0_17, %c0_18] : memref<128x128xf32, #tpu.memory_space<vmem>>, vector<128x128xf32>
    tpu.vector_store %arg7[%c0_17, %c0_18], %27 {strides = array<i32>} : memref<128x128xf32, #tpu.memory_space<vmem>>, vector<128x128xf32>,
    return
  }
}

</mosaic_0001>

<bundles_post_ra>
// kernel: tpu_custom_call.1
= control target key start
LH: loop header
LB: loop body
LE: loop exit
PB: predicated region body
PF: predicated region fallthrough
CT: control target
= control target key end

     0   :  { %vm124_vm0 = vcmask 130048   ;;  %v1188_v3 = vmov 0   ;;  %s1541_s0 = inlined_call_operand.vmem [shape: bf16[128,128], index: 0, kind: input, shape index: {}]   ;;  %s1542_s1 = inlined_call_operand.vmem [shape: f32[128,1], index: 1, kind: input, shape index: {}]   ;;  %s1543_s2 = inlined_call_operand.vmem [shape: bf16[128,16], index: 2, kind: input, shape index: {}]   ;;  %s1544_s3 = inlined_call_operand.vmem [shape: bf16[16,128], index: 3, kind: input, shape index: {}]   ;;  %s1545_s4 = inlined_call_operand.vmem [shape: f32[1,128], index: 4, kind: input, shape index: {}]   ;;  %s1546_s5 = inlined_call_operand.vmem [shape: bf16[128,128], index: 5, kind: input, shape index: {}]   ;;  %s1547_s6 = inlined_call_operand.vmem [shape: f32[1,128], index: 6, kind: input, shape index: {}]   ;;  %s1548_s7 = inlined_call_operand.hbm [shape: f32[128,128], index: 7, kind: output, shape index: {}]  }
   0x1   :  { %v1139_v0 = vld [vmem:[%s1544_s3] sm:$0xff]   ;;  %v1141_v2 = vld [vmem:[%s1543_s2 + $0x8] sm:$0xff]   ;;  %1137 = vset.pattern.permute.xlu0 %v1188_v3  ;;  %v1142_v4 = vld [vmem:[%s1543_s2 + $0x10] sm:$0xff]   ;;  %1138 = vset.pattern.permute.xlu1 %v1188_v3 }
   0x2   :  { %v1140_v1 = vld [vmem:[%s1543_s2] sm:$0xff]   ;;  %1003 = vmatprep.subr.bf16.mxu0 %v1139_v0  ;;  %v46_v6 = vld [vmem:[%s1542_s1 + $0x10] sm:$0xff]  ;;  %v1143_v7 = vld [vmem:[%s1543_s2 + $0x18] sm:$0xff]  }
   0x3   :  { %1004 = vmatpush3.bf16.msra.mxu0 %v1139_v0  ;;  %1005 = vmatprep.mubr.msk.bf16.mxu0 %vm124_vm0, %v1140_v1  ;;  %v44_v5 = vld [vmem:[%s1542_s1] sm:$0xff]  ;;  %v45_v9 = vld [vmem:[%s1542_s1 + $0x8] sm:$0xff]  ;;  %v47_v10 = vld [vmem:[%s1542_s1 + $0x18] sm:$0xff] }
   0x4   :  { %248 = vperm.xlu0 %1137, %v44_v5   ;;  %258 = vperm.xlu1 %1138, %v46_v6   ;;  %v1144_v8 = vld [vmem:[%s1543_s2 + $0x20] sm:$0xff]   ;;  %v49_v12 = vld [vmem:[%s1542_s1 + $0x28] sm:$0xff]  ;;  %v1146_v14 = vld [vmem:[%s1543_s2 + $0x30] sm:$0xff]  }
   0x5   :  { %v48_v11 = vld [vmem:[%s1542_s1 + $0x20] sm:$0xff]  ;;  %v1145_v13 = vld [vmem:[%s1543_s2 + $0x28] sm:$0xff]   ;;  %v50_v15 = vld [vmem:[%s1542_s1 + $0x30] sm:$0xff] }
   0x6   :  { %1006 = vmatmul.mubr.msk.bf16.vlgmr.msra.gmra.mrb[0].mxu0 %vm124_vm0, %v1141_v2  ;;  %v51_v16 = vld [vmem:[%s1542_s1 + $0x38] sm:$0xff]  ;;  %v52_v17 = vld [vmem:[%s1542_s1 + $0x40] sm:$0xff]  ;;  %v53_v18 = vld [vmem:[%s1542_s1 + $0x48] sm:$0xff] }
   0x7   :  { %1009 = vmatprep.mubr.msk.bf16.mxu0 %vm124_vm0, %v1142_v4 }
   0x8   :  { %253 = vperm.xlu0 %1137, %v45_v9   ;;  %263 = vperm.xlu1 %1138, %v47_v10  }
   0xc   :  { %268 = vperm.xlu0 %1137, %v48_v11   ;;  %273 = vperm.xlu1 %1138, %v49_v12  }
   0xe   :  { %1010 = vmatmul.mubr.msk.bf16.gmra.mrb[4].mxu0 %vm124_vm0, %v1143_v7 }
   0xf   :  { %1013 = vmatprep.mubr.msk.bf16.mxu0 %vm124_vm0, %v1144_v8 }
  0x10   :  { %278 = vperm.xlu0 %1137, %v50_v15   ;;  %283 = vperm.xlu1 %1138, %v51_v16  }
  0x16   :  { %1014 = vmatmul.mubr.msk.bf16.gmra.mrb[8].mxu0 %vm124_vm0, %v1145_v13 }
  0x17   :  { %1017 = vmatprep.mubr.msk.bf16.mxu0 %vm124_vm0, %v1146_v14 }
  0x18   :  { %12 = vsyncpa [#allocation3], 0  ;;  %v1147_v19 = vld [vmem:[%s1543_s2 + $0x38] sm:$0xff]   ;;  %288 = vperm.xlu0 %1137, %v52_v17   ;;  %293 = vperm.xlu1 %1138, %v53_v18   ;;  %v54_v20 = vld [vmem:[%s1542_s1 + $0x50] sm:$0xff] }
  0x19   :  { %v55_v21 = vld [vmem:[%s1542_s1 + $0x58] sm:$0xff]  ;;  %v56_v22 = vld [vmem:[%s1542_s1 + $0x60] sm:$0xff]  ;;  %v57_v23 = vld [vmem:[%s1542_s1 + $0x68] sm:$0xff] }
  0x1a   :  { %v58_v24 = vld [vmem:[%s1542_s1 + $0x70] sm:$0xff]  ;;  %v59_v25 = vld [vmem:[%s1542_s1 + $0x78] sm:$0xff]  ;;  %v1318_v26 = vld [vmem:[%s1541_s0] sm:$0xff]  }
  0x1b   :  { %1037 = vmatprep.mubr.bf16.mxu1 %v1318_v26  ;;  %v1156_v27 = vld [vmem:[%s1546_s5] sm:$0xff]   ;;  %v1157_v28 = vld [vmem:[%s1546_s5 + $0x8] sm:$0xff]   ;;  %v1158_v29 = vld [vmem:[%s1546_s5 + $0x10] sm:$0xff]  }
  0x1c   :  { %298 = vperm.xlu0 %1137, %v54_v20   ;;  %303 = vperm.xlu1 %1138, %v55_v21   ;;  %v1159_v30 = vld [vmem:[%s1546_s5 + $0x18] sm:$0xff]   ;;  %v1160_v31 = vld [vmem:[%s1546_s5 + $0x20] sm:$0xff]  }
  0x1d   :  { %1053 = vmatprep.subr.bf16.mxu0 %v1156_v27 }
  0x1e   :  { %1018 = vmatmul.mubr.msk.bf16.gmra.mrb[12].mxu0 %vm124_vm0, %v1147_v19 }
  0x1f   :  { %1054 = vmatpush3.bf16.msra.mxu0 %v1156_v27  ;;  %v1396_v27 = vld [vmem:[%s1541_s0 + $0x18] sm:$0xff]  }
  0x20   :  { %308 = vperm.xlu0 %1137, %v56_v22   ;;  %313 = vperm.xlu1 %1138, %v57_v23  }
  0x21   :  { %1055 = vmatprep.subr.bf16.mxu0 %v1157_v28 }
  0x23   :  { %1056 = vmatpush3.bf16.msra.mxu0 %v1157_v28  ;;  %v1401_v28 = vld [vmem:[%s1541_s0 + $0x20] sm:$0xff]  }
  0x24   :  { %318 = vperm.xlu0 %1137, %v58_v24   ;;  %323 = vperm.xlu1 %1138, %v59_v25   ;;  %v1387_v24 = vld [vmem:[%s1541_s0 + $0x8] sm:$0xff]   ;;  %v1150_v25 = vld [vmem:[%s1541_s0 + $0x10] sm:$0xff]  }
  0x25   :  { %1057 = vmatprep.subr.bf16.mxu0 %v1158_v29 }
  0x27   :  { %1058 = vmatpush3.bf16.msra.mxu0 %v1158_v29  ;;  %v1408_v29 = vld [vmem:[%s1541_s0 + $0x28] sm:$0xff]  }
  0x28   :  { %1059 = vmatprep.subr.bf16.mxu0 %v1159_v30 }
  0x2b   :  { %1060 = vmatpush3.bf16.msra.mxu0 %v1159_v30  ;;  %v1413_v30 = vld [vmem:[%s1541_s0 + $0x30] sm:$0xff]  }
  0x2c   :  { %1061 = vmatprep.subr.bf16.mxu0 %v1160_v31 }
  0x2f   :  { %1062 = vmatpush3.bf16.msra.mxu0 %v1160_v31  ;;  %v1420_v31 = vld [vmem:[%s1541_s0 + $0x38] sm:$0xff]  }
  0x83   :  { %v1336_v32 = vpop.permute.xlu0 %248  ;;  %v1338_v33 = vpop.permute.xlu1 %258 }
  0x87   :  { %v1340_v34 = vpop.permute.xlu0 %253  ;;  %v1342_v35 = vpop.permute.xlu1 %263 }
  0x8b   :  { %v1344_v36 = vpop.permute.xlu0 %268  ;;  %v1346_v37 = vpop.permute.xlu1 %273 }
  0x8f   :  { %v1348_v39 = vpop.permute.xlu0 %278  ;;  %v1350_v41 = vpop.permute.xlu1 %283 }
  0x97   :  { %v1356_v50 = vpop.permute.xlu0 %288  ;;  %v1358_v51 = vpop.permute.xlu1 %293 }
  0x9b   :  { %v1364_v60 = vpop.permute.xlu0 %298  ;;  %v1366_v62 = vpop.permute.xlu1 %303 }
  0x9f   :  { %v1368_v3 = vpop.permute.xlu0 %308  ;;  %v1372_v7 = vpop.permute.xlu1 %313 }
  0xa3   :  { %v1376_v13 = vpop.permute.xlu0 %318  ;;  %v1378_v15 = vpop.permute.xlu1 %323 }
  0xd9   :  { %v1007_v38 = vpop.f32.mrb[0].mxu0 }
  0xda   :  { %v183_v40 = vpop.f32.mrb[1].mxu0  ;;  %v328_v43 = vmul.f32 %v1007_v38, %v1338_v33  ;;  %v1161_v38 = vld [vmem:[%s1546_s5 + $0x28] sm:$0xff]  }
  0xdb   :  { %v1008_v42 = vpop.f32.mrb[2].mxu0  ;;  %v326_v46 = vmul.f32 %v1336_v32, %v183_v40  ;;  %1063 = vmatprep.subr.bf16.mxu0 %v1161_v38  ;;  %v1162_v40 = vld [vmem:[%s1546_s5 + $0x30] sm:$0xff]  }
  0xdc   :  { %v329_v44 = vmul.f32 %v1008_v42, %v1342_v35  ;;  %v186_v45 = vpop.f32.mrb[3].mxu0  ;;  %1064 = vmatpush3.bf16.msra.mxu0 %v1161_v38  ;;  %v1163_v42 = vld [vmem:[%s1546_s5 + $0x38] sm:$0xff]  }
  0xdd   :  { %v327_v47 = vmul.f32 %v1340_v34, %v186_v45  ;;  %1065 = vmatprep.subr.bf16.mxu0 %v1162_v40 }
  0xde   :  { %v343_v48 = vpack.c.bf16 %v329_v44, %v328_v43  ;;  %v1435_v44 = vld [vmem:[%s1545_s4] ss:$0 sm:$0xff] }
  0xdf   :  { %v342_v49 = vpack.c.bf16 %v327_v47, %v326_v46 }
  0xe0   :  { %1066 = vmatpush3.bf16.msra.mxu0 %v1162_v40 }
  0xe1   :  { %v1011_v52 = vpop.f32.mrb[4].mxu0  ;;  %1021 = vmatprep.subr.bf16.mxu1 %v342_v49  ;;  %1067 = vmatprep.subr.bf16.mxu0 %v1163_v42 }
  0xe2   :  { %v199_v53 = vpop.f32.mrb[5].mxu0  ;;  %1022 = vmatpush3.bf16.msra.mxu1 %v342_v49  ;;  %v332_v55 = vmul.f32 %v1011_v52, %v1348_v39 }
  0xe3   :  { %v1012_v54 = vpop.f32.mrb[6].mxu0  ;;  %1023 = vmatprep.subr.bf16.mxu1 %v343_v48  ;;  %v330_v58 = vmul.f32 %v1344_v36, %v199_v53 }
  0xe4   :  { %v333_v56 = vmul.f32 %v1012_v54, %v1350_v41  ;;  %v202_v57 = vpop.f32.mrb[7].mxu0  ;;  %1068 = vmatpush3.bf16.msra.mxu0 %v1163_v42 }
  0xe5   :  { %v331_v59 = vmul.f32 %v1346_v37, %v202_v57 }
  0xe6   :  { %v345_v61 = vpack.c.bf16 %v333_v56, %v332_v55  ;;  %1024 = vmatpush3.bf16.msra.mxu1 %v343_v48 }
  0xe7   :  { %v344_v63 = vpack.c.bf16 %v331_v59, %v330_v58 }
  0xe9   :  { %v1015_v0 = vpop.f32.mrb[8].mxu0  ;;  %1025 = vmatprep.subr.bf16.mxu1 %v344_v63 }
  0xea   :  { %v215_v1 = vpop.f32.mrb[9].mxu0  ;;  %1026 = vmatpush3.bf16.msra.mxu1 %v344_v63  ;;  %v336_v4 = vmul.f32 %v1015_v0, %v1364_v60 }
  0xeb   :  { %v1016_v2 = vpop.f32.mrb[10].mxu0  ;;  %1027 = vmatprep.subr.bf16.mxu1 %v345_v61  ;;  %v334_v8 = vmul.f32 %v1356_v50, %v215_v1 }
  0xec   :  { %v337_v5 = vmul.f32 %v1016_v2, %v1366_v62  ;;  %v218_v6 = vpop.f32.mrb[11].mxu0 }
  0xed   :  { %v335_v9 = vmul.f32 %v1358_v51, %v218_v6 }
  0xee   :  { %v347_v10 = vpack.c.bf16 %v337_v5, %v336_v4  ;;  %1028 = vmatpush3.bf16.msra.mxu1 %v345_v61 }
  0xef   :  { %v346_v11 = vpack.c.bf16 %v335_v9, %v334_v8 }
  0xf1   :  { %v1019_v12 = vpop.f32.mrb[12].mxu0  ;;  %1029 = vmatprep.subr.bf16.mxu1 %v346_v11 }
  0xf2   :  { %v231_v14 = vpop.f32.mrb[13].mxu0  ;;  %1030 = vmatpush3.bf16.msra.mxu1 %v346_v11  ;;  %v340_v17 = vmul.f32 %v1019_v12, %v1376_v13 }
  0xf3   :  { %v1020_v16 = vpop.f32.mrb[14].mxu0  ;;  %1031 = vmatprep.subr.bf16.mxu1 %v347_v10  ;;  %v338_v20 = vmul.f32 %v1368_v3, %v231_v14 }
  0xf4   :  { %v341_v18 = vmul.f32 %v1020_v16, %v1378_v15  ;;  %v234_v19 = vpop.f32.mrb[15].mxu0 }
  0xf5   :  { %v339_v21 = vmul.f32 %v1372_v7, %v234_v19 }
  0xf6   :  { %v349_v22 = vpack.c.bf16 %v341_v18, %v340_v17  ;;  %1032 = vmatpush3.bf16.msra.mxu1 %v347_v10 }
  0xf7   :  { %v348_v23 = vpack.c.bf16 %v339_v21, %v338_v20 }
  0xf9   :  { %1033 = vmatprep.subr.bf16.mxu1 %v348_v23 }
  0xfa   :  { %1034 = vmatpush3.bf16.msra.mxu1 %v348_v23 }
  0xfb   :  { %1035 = vmatprep.subr.bf16.mxu1 %v349_v22 }
  0xfe   :  { %1036 = vmatpush3.bf16.msra.mxu1 %v349_v22 }
 0x101   :  { %1038 = vmatmul.mubr.bf16.vlgmr.msra.gmra.mrb[0].mxu1 %v1387_v24 }
 0x102   :  { %1041 = vmatprep.mubr.bf16.mxu1 %v1150_v25 }
 0x109   :  { %1042 = vmatmul.mubr.bf16.gmra.mrb[4].mxu1 %v1396_v27 }
 0x10a   :  { %1045 = vmatprep.mubr.bf16.mxu1 %v1401_v28 }
 0x111   :  { %1046 = vmatmul.mubr.bf16.gmra.mrb[8].mxu1 %v1408_v29 }
 0x112   :  { %1049 = vmatprep.mubr.bf16.mxu1 %v1413_v30 }
 0x119   :  { %1050 = vmatmul.mubr.bf16.gmra.mrb[12].mxu1 %v1420_v31 }
 0x11a   :  { %1105 = vmatprep.mubr.bf16.mxu1 %v1150_v25 }
 0x1d4   :  { %v1039_v43 = vpop.f32.mrb[0].mxu1 }
 0x1d5   :  { %v497_v45 = vmul.f32 %v1039_v43, %v1338_v33  ;;  %v432_v46 = vpop.f32.mrb[1].mxu1 }
 0x1d6   :  { %v495_v47 = vmul.f32 %v432_v46, %v1336_v32  ;;  %v1040_v48 = vpop.f32.mrb[2].mxu1 }
 0x1d7   :  { %v520_v49 = vadd.f32 %v1435_v44, %v497_v45  ;;  %v498_v52 = vmul.f32 %v1040_v48, %v1342_v35  ;;  %v435_v53 = vpop.f32.mrb[3].mxu1 }
 0x1d8   :  { %v518_v54 = vadd.f32 %v1435_v44, %v495_v47  ;;  %v496_v55 = vmul.f32 %v435_v53, %v1340_v34 }
 0x1d9   :  { %v521_v56 = vadd.f32 %v1435_v44, %v498_v52  ;;  %v536_v58 = vmax.f32 %v520_v49, 0.0 }
 0x1da   :  { %v519_v57 = vadd.f32 %v1435_v44, %v496_v55  ;;  %v534_v61 = vmax.f32 %v518_v54, 0.0 }
 0x1db   :  { %v537_v59 = vmax.f32 %v521_v56, 0.0 }
 0x1dc   :  { %v535_v63 = vmax.f32 %v519_v57, 0.0  ;;  %v1043_v0 = vpop.f32.mrb[4].mxu1 }
 0x1dd   :  { %v551_v1 = vpack.c.bf16 %v537_v59, %v536_v58  ;;  %v501_v2 = vmul.f32 %v1043_v0, %v1348_v39  ;;  %v448_v4 = vpop.f32.mrb[5].mxu1 }
 0x1de   :  { %v499_v5 = vmul.f32 %v448_v4, %v1344_v36  ;;  %v1044_v6 = vpop.f32.mrb[6].mxu1  ;;  %v550_v8 = vpack.c.bf16 %v535_v63, %v534_v61 }
 0x1df   :  { %v524_v9 = vadd.f32 %v1435_v44, %v501_v2  ;;  %v502_v10 = vmul.f32 %v1044_v6, %v1350_v41  ;;  %v451_v11 = vpop.f32.mrb[7].mxu1 }
 0x1e0   :  { %v522_v12 = vadd.f32 %v1435_v44, %v499_v5  ;;  %v500_v14 = vmul.f32 %v451_v11, %v1346_v37  ;;  %1069 = vmatprep.mubr.bf16.mxu0 %v550_v8 }
 0x1e1   :  { %v525_v16 = vadd.f32 %v1435_v44, %v502_v10  ;;  %1070 = vmatmul.mubr.bf16.vlgmr.msra.gmra.mrb[16].mxu0 %v551_v1  ;;  %v540_v18 = vmax.f32 %v524_v9, 0.0 }
 0x1e2   :  { %v523_v17 = vadd.f32 %v1435_v44, %v500_v14  ;;  %v538_v20 = vmax.f32 %v522_v12, 0.0 }
 0x1e3   :  { %v541_v19 = vmax.f32 %v525_v16, 0.0 }
 0x1e4   :  { %v539_v21 = vmax.f32 %v523_v17, 0.0  ;;  %v1047_v22 = vpop.f32.mrb[8].mxu1 }
 0x1e5   :  { %v505_v23 = vmul.f32 %v1047_v22, %v1364_v60  ;;  %v464_v25 = vpop.f32.mrb[9].mxu1  ;;  %v553_v38 = vpack.c.bf16 %v541_v19, %v540_v18 }
 0x1e6   :  { %v503_v40 = vmul.f32 %v464_v25, %v1356_v50  ;;  %v1048_v42 = vpop.f32.mrb[10].mxu1  ;;  %v552_v43 = vpack.c.bf16 %v539_v21, %v538_v20 }
 0x1e7   :  { %v528_v45 = vadd.f32 %v1435_v44, %v505_v23  ;;  %v506_v46 = vmul.f32 %v1048_v42, %v1366_v62  ;;  %v467_v47 = vpop.f32.mrb[11].mxu1 }
 0x1e8   :  { %v526_v48 = vadd.f32 %v1435_v44, %v503_v40  ;;  %v504_v49 = vmul.f32 %v467_v47, %v1358_v51  ;;  %1073 = vmatprep.mubr.bf16.mxu0 %v552_v43 }
 0x1e9   :  { %v529_v52 = vadd.f32 %v1435_v44, %v506_v46  ;;  %1074 = vmatmul.mubr.bf16.gmra.mrb[20].mxu0 %v553_v38  ;;  %v544_v54 = vmax.f32 %v528_v45, 0.0 }
 0x1ea   :  { %v527_v53 = vadd.f32 %v1435_v44, %v504_v49  ;;  %v542_v56 = vmax.f32 %v526_v48, 0.0 }
 0x1eb   :  { %v545_v55 = vmax.f32 %v529_v52, 0.0 }
 0x1ec   :  { %v543_v57 = vmax.f32 %v527_v53, 0.0  ;;  %v1051_v58 = vpop.f32.mrb[12].mxu1 }
 0x1ed   :  { %v509_v59 = vmul.f32 %v1051_v58, %v1376_v13  ;;  %v480_v61 = vpop.f32.mrb[13].mxu1  ;;  %v555_v63 = vpack.c.bf16 %v545_v55, %v544_v54 }
 0x1ee   :  { %v507_v0 = vmul.f32 %v480_v61, %v1368_v3  ;;  %v1052_v1 = vpop.f32.mrb[14].mxu1  ;;  %v554_v2 = vpack.c.bf16 %v543_v57, %v542_v56 }
 0x1ef   :  { %v532_v4 = vadd.f32 %v1435_v44, %v509_v59  ;;  %v510_v5 = vmul.f32 %v1052_v1, %v1378_v15  ;;  %v483_v6 = vpop.f32.mrb[15].mxu1 }
 0x1f0   :  { %v530_v8 = vadd.f32 %v1435_v44, %v507_v0  ;;  %v508_v9 = vmul.f32 %v483_v6, %v1372_v7  ;;  %1077 = vmatprep.mubr.bf16.mxu0 %v554_v2 }
 0x1f1   :  { %v533_v10 = vadd.f32 %v1435_v44, %v510_v5  ;;  %1078 = vmatmul.mubr.bf16.gmra.mrb[24].mxu0 %v555_v63  ;;  %v548_v12 = vmax.f32 %v532_v4, 0.0 }
 0x1f2   :  { %v531_v11 = vadd.f32 %v1435_v44, %v508_v9  ;;  %v546_v16 = vmax.f32 %v530_v8, 0.0 }
 0x1f3   :  { %v549_v14 = vmax.f32 %v533_v10, 0.0 }
 0x1f4   :  { %v547_v17 = vmax.f32 %v531_v11, 0.0 }
 0x1f5   :  { %v557_v18 = vpack.c.bf16 %v549_v14, %v548_v12 }
 0x1f6   :  { %v556_v19 = vpack.c.bf16 %v547_v17, %v546_v16 }
 0x1f8   :  { %1081 = vmatprep.mubr.bf16.mxu0 %v556_v19  ;;  %v1495_v19 = vld [vmem:[%s1547_s6] ss:$0 sm:$0xff]  ;;  %s1189_s6 = smov [#allocation2]  }
 0x1f9   :  { %1082 = vmatmul.mubr.bf16.gmra.mrb[28].mxu0 %v557_v18  ;;  %s900_s8 = sshll.u32 %s1189_s6, 4  ;;  %s901_s8 = int_to_ptr.vmem [resolvable:$true] %s900_s8 }
 0x1fa   :  { %1101 = vmatprep.mubr.bf16.mxu0 %v1318_v26  ;;  %s1164_s3 = scalar_lea.vmem %s901_s8, 2048  ;;  %p1169_p1 = scmp.lt.s32.totalorder %s901_s8, %s901_s8 }
 0x1fb   :  { %p1165_p0 = scmp.ne.s32.totalorder %s901_s8, %s1164_s3  ;;  %p1170_p2 = scmp.lt.s32.totalorder %s1164_s3, %s1164_s3 }
 0x1fd   :  { %p1171_p3 = por %p1170_p2, %p1169_p1 }
 0x1ff   :  { %p1172_p4 = pnand %p1171_p3, %p1165_p0 }
 0x2b4   :  { %v1071_v20 = vpop.f32.mrb[16].mxu0 }
 0x2b5   :  { %v656_v21 = vpop.f32.mrb[17].mxu0  ;;  %v721_v23 = vmul.f32 %v1071_v20, %v1338_v33 }
 0x2b6   :  { %v1072_v22 = vpop.f32.mrb[18].mxu0  ;;  %v719_v44 = vmul.f32 %v656_v21, %v1336_v32 }
 0x2b7   :  { %v722_v25 = vmul.f32 %v1072_v22, %v1342_v35  ;;  %v659_v38 = vpop.f32.mrb[19].mxu0 }
 0x2b8   :  { %v720_v40 = vmul.f32 %v659_v38, %v1340_v34 }
 0x2b9   :  { %v736_v42 = vpack.c.bf16 %v722_v25, %v721_v23 }
 0x2ba   :  { %v735_v43 = vpack.c.bf16 %v720_v40, %v719_v44 }
 0x2bc   :  { %v1075_v45 = vpop.f32.mrb[20].mxu0  ;;  %1085 = vmatprep.subr.bf16.mxu0 %v735_v43  ;;  %1117 = vmatprep.subr.bf16.mxu1 %v735_v43 }
 0x2bd   :  { %v672_v46 = vpop.f32.mrb[21].mxu0  ;;  %1086 = vmatpush3.bf16.msra.mxu0 %v735_v43  ;;  %1125 = vmatpush3.bf16.msra.mxu1 %v735_v43  ;;  %v725_v47 = vmul.f32 %v1075_v45, %v1348_v39 }
 0x2be   :  { %v1076_v26 = vpop.f32.mrb[22].mxu0  ;;  %1087 = vmatprep.subr.bf16.mxu0 %v736_v42  ;;  %1118 = vmatprep.subr.bf16.mxu1 %v736_v42  ;;  %v723_v52 = vmul.f32 %v672_v46, %v1344_v36 }
 0x2bf   :  { %v726_v48 = vmul.f32 %v1076_v26, %v1350_v41  ;;  %v675_v49 = vpop.f32.mrb[23].mxu0 }
 0x2c0   :  { %v724_v53 = vmul.f32 %v675_v49, %v1346_v37 }
 0x2c1   :  { %v738_v54 = vpack.c.bf16 %v726_v48, %v725_v47  ;;  %1088 = vmatpush3.bf16.msra.mxu0 %v736_v42  ;;  %1126 = vmatpush3.bf16.msra.mxu1 %v736_v42 }
 0x2c2   :  { %v737_v55 = vpack.c.bf16 %v724_v53, %v723_v52 }
 0x2c4   :  { %v1079_v56 = vpop.f32.mrb[24].mxu0  ;;  %1089 = vmatprep.subr.bf16.mxu0 %v737_v55  ;;  %1119 = vmatprep.subr.bf16.mxu1 %v737_v55 }
 0x2c5   :  { %v688_v57 = vpop.f32.mrb[25].mxu0  ;;  %1090 = vmatpush3.bf16.msra.mxu0 %v737_v55  ;;  %1127 = vmatpush3.bf16.msra.mxu1 %v737_v55  ;;  %v729_v59 = vmul.f32 %v1079_v56, %v1364_v60 }
 0x2c6   :  { %v1080_v58 = vpop.f32.mrb[26].mxu0  ;;  %1091 = vmatprep.subr.bf16.mxu0 %v738_v54  ;;  %1120 = vmatprep.subr.bf16.mxu1 %v738_v54  ;;  %v727_v0 = vmul.f32 %v688_v57, %v1356_v50 }
 0x2c7   :  { %v730_v61 = vmul.f32 %v1080_v58, %v1366_v62  ;;  %v691_v63 = vpop.f32.mrb[27].mxu0 }
 0x2c8   :  { %v728_v1 = vmul.f32 %v691_v63, %v1358_v51 }
 0x2c9   :  { %v740_v2 = vpack.c.bf16 %v730_v61, %v729_v59  ;;  %1092 = vmatpush3.bf16.msra.mxu0 %v738_v54  ;;  %1128 = vmatpush3.bf16.msra.mxu1 %v738_v54 }
 0x2ca   :  { %v739_v4 = vpack.c.bf16 %v728_v1, %v727_v0 }
 0x2cc   :  { %v1083_v5 = vpop.f32.mrb[28].mxu0  ;;  %1093 = vmatprep.subr.bf16.mxu0 %v739_v4  ;;  %1121 = vmatprep.subr.bf16.mxu1 %v739_v4 }
 0x2cd   :  { %v704_v6 = vpop.f32.mrb[29].mxu0  ;;  %1094 = vmatpush3.bf16.msra.mxu0 %v739_v4  ;;  %1129 = vmatpush3.bf16.msra.mxu1 %v739_v4  ;;  %v733_v9 = vmul.f32 %v1083_v5, %v1376_v13 }
 0x2ce   :  { %v1084_v8 = vpop.f32.mrb[30].mxu0  ;;  %1095 = vmatprep.subr.bf16.mxu0 %v740_v2  ;;  %1122 = vmatprep.subr.bf16.mxu1 %v740_v2  ;;  %v731_v12 = vmul.f32 %v704_v6, %v1368_v3 }
 0x2cf   :  { %v734_v10 = vmul.f32 %v1084_v8, %v1378_v15  ;;  %v707_v11 = vpop.f32.mrb[31].mxu0 }
 0x2d0   :  { %v732_v14 = vmul.f32 %v707_v11, %v1372_v7 }
 0x2d1   :  { %v742_v16 = vpack.c.bf16 %v734_v10, %v733_v9  ;;  %1096 = vmatpush3.bf16.msra.mxu0 %v740_v2  ;;  %1130 = vmatpush3.bf16.msra.mxu1 %v740_v2 }
 0x2d2   :  { %v741_v17 = vpack.c.bf16 %v732_v14, %v731_v12 }
 0x2d4   :  { %1097 = vmatprep.subr.bf16.mxu0 %v741_v17  ;;  %1123 = vmatprep.subr.bf16.mxu1 %v741_v17 }
 0x2d5   :  { %1098 = vmatpush3.bf16.msra.mxu0 %v741_v17  ;;  %1131 = vmatpush3.bf16.msra.mxu1 %v741_v17 }
 0x2d6   :  { %1099 = vmatprep.subr.bf16.mxu0 %v742_v16  ;;  %1124 = vmatprep.subr.bf16.mxu1 %v742_v16 }
 0x2d9   :  { %1100 = vmatpush3.bf16.msra.mxu0 %v742_v16  ;;  %1132 = vmatpush3.bf16.msra.mxu1 %v742_v16 }
 0x2dc   :  { %1102 = vmatmul.mubr.bf16.vlgmr.msra.gmra.mrb[32].mxu0 %v1387_v24  ;;  %1106 = vmatmul.mubr.bf16.vlgmr.msra.gmra.mrb[16].mxu1 %v1396_v27 }
 0x2dd   :  { %1109 = vmatprep.mubr.bf16.mxu1 %v1401_v28 }
 0x2e4   :  { %1110 = vmatmul.mubr.bf16.gmra.mrb[20].mxu1 %v1408_v29 }
 0x2e5   :  { %1113 = vmatprep.mubr.bf16.mxu1 %v1413_v30 }
 0x2ec   :  { %1114 = vmatmul.mubr.bf16.gmra.mrb[24].mxu1 %v1420_v31 }
 0x3af   :  { %v1103_v18 = vpop.f32.mrb[32].mxu0  ;;  %v1107_v20 = vpop.f32.mrb[16].mxu1 }
 0x3b0   :  { %v842_v21 = vmul.f32 %v1103_v18, %v1338_v33  ;;  %v846_v24 = vmul.f32 %v1107_v20, %v1348_v39  ;;  %v777_v27 = vpop.f32.mrb[33].mxu0  ;;  %v793_v22 = vpop.f32.mrb[17].mxu1 }
 0x3b1   :  { %v840_v28 = vmul.f32 %v777_v27, %v1336_v32  ;;  %v844_v29 = vmul.f32 %v793_v22, %v1344_v36  ;;  %v1104_v30 = vpop.f32.mrb[34].mxu0  ;;  %v1108_v23 = vpop.f32.mrb[18].mxu1 }
 0x3b2   :  { %v865_v31 = vadd.f32 %v1495_v19, %v842_v21  ;;  %v869_v25 = vadd.f32 %v1495_v19, %v846_v24  ;;  %v843_v38 = vmul.f32 %v1104_v30, %v1342_v35  ;;  %v847_v44 = vmul.f32 %v1108_v23, %v1350_v41  ;;  %v780_v40 = vpop.f32.mrb[35].mxu0  ;;  %v796_v33 = vpop.f32.mrb[19].mxu1 }
 0x3b3   :  { %v863_v39 = vadd.f32 %v1495_v19, %v840_v28  ;;  %v867_v42 = vadd.f32 %v1495_v19, %v844_v29  ;;  %v841_v32 = vmul.f32 %v780_v40, %v1340_v34  ;;  %v845_v36 = vmul.f32 %v796_v33, %v1346_v37 }
 0x3b4   :  { %881 = vst [vmem:[#allocation2 + $0x10] sm:$0xff] %v865_v31  ;;  %885 = vst [vmem:[#allocation2 + $0x30] sm:$0xff] %v869_v25  ;;  %v866_v43 = vadd.f32 %v1495_v19, %v843_v38  ;;  %v870_v45 = vadd.f32 %v1495_v19, %v847_v44 }
 0x3b5   :  { %879 = vst [vmem:[#allocation2] sm:$0xff] %v863_v39  ;;  %883 = vst [vmem:[#allocation2 + $0x20] sm:$0xff] %v867_v42  ;;  %v864_v35 = vadd.f32 %v1495_v19, %v841_v32  ;;  %v868_v41 = vadd.f32 %v1495_v19, %v845_v36 }
 0x3b6   :  { %882 = vst [vmem:[#allocation2 + $0x18] sm:$0xff] %v866_v43  ;;  %886 = vst [vmem:[#allocation2 + $0x38] sm:$0xff] %v870_v45 }
 0x3b7   :  { %880 = vst [vmem:[#allocation2 + $0x8] sm:$0xff] %v864_v35  ;;  %884 = vst [vmem:[#allocation2 + $0x28] sm:$0xff] %v868_v41  ;;  %v1111_v46 = vpop.f32.mrb[20].mxu1 }
 0x3b8   :  { %v850_v34 = vmul.f32 %v1111_v46, %v1364_v60  ;;  %v809_v37 = vpop.f32.mrb[21].mxu1 }
 0x3b9   :  { %v848_v26 = vmul.f32 %v809_v37, %v1356_v50  ;;  %v1112_v47 = vpop.f32.mrb[22].mxu1 }
 0x3ba   :  { %v873_v48 = vadd.f32 %v1495_v19, %v850_v34  ;;  %v851_v49 = vmul.f32 %v1112_v47, %v1366_v62  ;;  %v812_v52 = vpop.f32.mrb[23].mxu1 }
 0x3bb   :  { %v871_v53 = vadd.f32 %v1495_v19, %v848_v26  ;;  %v849_v54 = vmul.f32 %v812_v52, %v1358_v51 }
 0x3bc   :  { %889 = vst [vmem:[#allocation2 + $0x50] sm:$0xff] %v873_v48  ;;  %v874_v55 = vadd.f32 %v1495_v19, %v851_v49 }
 0x3bd   :  { %887 = vst [vmem:[#allocation2 + $0x40] sm:$0xff] %v871_v53  ;;  %v872_v56 = vadd.f32 %v1495_v19, %v849_v54 }
 0x3be   :  { %890 = vst [vmem:[#allocation2 + $0x58] sm:$0xff] %v874_v55 }
 0x3bf   :  { %888 = vst [vmem:[#allocation2 + $0x48] sm:$0xff] %v872_v56  ;;  %v1115_v60 = vpop.f32.mrb[24].mxu1 }
 0x3c0   :  { %v854_v50 = vmul.f32 %v1115_v60, %v1376_v13  ;;  %v825_v57 = vpop.f32.mrb[25].mxu1 }
 0x3c1   :  { %v852_v58 = vmul.f32 %v825_v57, %v1368_v3  ;;  %v1116_v62 = vpop.f32.mrb[26].mxu1 }
 0x3c2   :  { %v877_v59 = vadd.f32 %v1495_v19, %v854_v50  ;;  %v855_v51 = vmul.f32 %v1116_v62, %v1378_v15  ;;  %v828_v61 = vpop.f32.mrb[27].mxu1 }
 0x3c3   :  { %v875_v63 = vadd.f32 %v1495_v19, %v852_v58  ;;  %v853_v0 = vmul.f32 %v828_v61, %v1372_v7 }
 0x3c4   :  { %893 = vst [vmem:[#allocation2 + $0x70] sm:$0xff] %v877_v59  ;;  %v878_v1 = vadd.f32 %v1495_v19, %v855_v51 }
 0x3c5   :  { %891 = vst [vmem:[#allocation2 + $0x60] sm:$0xff] %v875_v63  ;;  %v876_v13 = vadd.f32 %v1495_v19, %v853_v0 }
 0x3c6   :  { %894 = vst [vmem:[#allocation2 + $0x78] sm:$0xff] %v878_v1 }
 0x3c7   :  { %892 = vst [vmem:[#allocation2 + $0x68] sm:$0xff] %v876_v13 }
 0x3c8   :  { %1175 = shalt.err (!%p1172_p4)
}
 0x3c9   :  { %s1176_s11 = scalar_lea.hbm %s1548_s7, 2048 }
 0x3ca   :  { %p1177_p5 = scmp.ne.s32.totalorder %s1548_s7, %s1176_s11  ;;  %p1180_p6 = scmp.lt.u32.totalorder %s1176_s11, %s1548_s7 }
 0x3cc   :  { %p1182_p7 = pnand %p1180_p6, %p1177_p5 }
 0x3ce   :  { %1185 = shalt.err (!%p1182_p7)
}
 0x3cf   :  { %s1190_s16 = smov 128   ;;  %s1191_s17 = smov 8  }
 0x3d0   :  { %906 = dma.vmem_to_hbm [thread:$0]  %s901_s8, 2048, %s1548_s7, [#allocation3], %s1190_s16, %s1190_s16, %s1191_s17  }
 0x3d1   :  { %1186 = dma.done.wait [#allocation3], 2048  }
 0x3d2   :  { %1187 = vsyncadd [#allocation3], 4294965248 }
 0x3d3   :  { %910 = vsyncpa [#allocation3], 1 }

</bundles_post_ra>
